<compile_context>
chip_gen: v6e
topology: v6e:2x2x1
jax: 0.10.0
libtpu: 0.0.40
codegen_flags: <defaults>
</compile_context>

<pallas_src>
import math
import numpy as np

import jax
import jax.numpy as jnp
from jax.experimental import pallas as pl
from jax.experimental.pallas import tpu as pltpu


def _pool_geometry(H, W, level):
    """Static pooling geometry, mirroring the PyTorch formulas exactly.

    Returns (oh, ow, kh, kw, row_groups, col_groups) where row/col groups are
    the clipped [start, end) ranges of each pooling window along H / W.
    """
    kh = math.ceil(H / level)
    kw = math.ceil(W / level)
    ph = (kh * level - H + 1) // 2
    pw = (kw * level - W + 1) // 2
    oh = (H + 2 * ph - kh) // kh + 1
    ow = (W + 2 * pw - kw) // kw + 1
    row_groups = [(max(r * kh - ph, 0), min(r * kh - ph + kh, H)) for r in range(oh)]
    col_groups = [(max(c * kw - pw, 0), min(c * kw - pw + kw, W)) for c in range(ow)]
    for (lo, hi) in row_groups + col_groups:
        if hi <= lo:
            # PyTorch itself rejects these configs (pad > kernel_size/2).
            raise ValueError(
                f"SPP level {level} produces an empty pooling window for input "
                f"size {(H, W)}; require spatial dims comfortably >= num_levels.")
    return oh, ow, kh, kw, row_groups, col_groups


def _bilinear_matrix(out_size, in_size):
    """R[o, i]: bilinear interpolation weights, align_corners=True (PyTorch)."""
    R = np.zeros((out_size, in_size), dtype=np.float32)
    for o in range(out_size):
        if out_size > 1 and in_size > 1:
            src = o * (in_size - 1) / (out_size - 1)
        else:
            src = 0.0
        i0 = min(int(math.floor(src)), in_size - 1)
        i1 = min(i0 + 1, in_size - 1)
        w1 = src - i0
        R[o, i0] += 1.0 - w1
        R[o, i1] += w1
    return R


def _choose_c_block(C, H, W, num_levels, itemsize):
    """Largest channel block (C itself, or a multiple-of-8 divisor of C) whose
    per-grid-step footprint stays well under the scoped VMEM limit."""
    HW = H * W
    budget = 20 * 1024 * 1024          # headroom under the 32 MiB scoped limit

    def step_bytes(cb):
        x_bytes = 2 * 2 * cb * HW * itemsize                   # x + x_flat, double-buffered
        o_bytes = 2 * (num_levels + 1) * cb * HW * itemsize    # output, double-buffered
        tmp_bytes = 4 * cb * HW * 4                            # in-kernel f32 temporaries (rough)
        return x_bytes + o_bytes + tmp_bytes

    if C <= 8 or step_bytes(C) <= budget:
        return C
    for cb in (512, 256, 128, 64, 32, 16, 8):
        if C % cb == 0 and step_bytes(cb) <= budget:
            return cb
    for cb in (8, 16, 32, 64, 128, 256, 512):
        if C % cb == 0:
            return cb
    return C


def _make_spp_kernel(levels_geom, level_offsets, pool_type):
    """Fused kernel: all pyramid levels + identity copy for one (b, c-block)."""
    num_levels = len(levels_geom)

    def kernel(x4_ref, xflat_ref, wmap_ref, o_ref):
        # x4_ref:    (C_blk, H, W)         -- spatial view for pooling
        # xflat_ref: (C_blk, H*W)          -- lane-dense view for the identity copy
        # wmap_ref:  (sum(oh*ow), H*W)     -- stacked flat bilinear weight rows
        # o_ref:     (num_levels + 1, C_blk, H*W)
        xf = x4_ref[...].astype(jnp.float32)
        red = jnp.max if pool_type == 'max_pool' else jnp.sum

        for lvl, (oh, ow, kh, kw, row_groups, col_groups) in enumerate(levels_geom):
            # Stage 1: reduce W inside each column group -> (C_blk, H, 1) each.
            col_parts = [red(xf[:, :, cs:ce], axis=2, keepdims=True)
                         for (cs, ce) in col_groups]
            # Stage 2: reduce H inside each row group -> one (C_blk, 1) per window.
            cols = []
            for (rs, re) in row_groups:
                for s in range(ow):
                    cols.append(red(col_parts[s][:, rs:re, :], axis=1))
            pooled = cols[0] if len(cols) == 1 else jnp.concatenate(cols, axis=1)
            if pool_type == 'avg_pool':
                # count_include_pad=True: divide clipped windows by full kh*kw.
                pooled = pooled * (1.0 / float(kh * kw))

            off = level_offsets[lvl]
            wm = wmap_ref[off:off + oh * ow, :]                 # (oh*ow, H*W), static slice
            up = jnp.dot(pooled, wm, preferred_element_type=jnp.float32)  # MXU
            o_ref[lvl] = up.astype(o_ref.dtype)

        # Identity branch (last C channels of the concatenated output).
        o_ref[num_levels] = xflat_ref[...]

    return kernel


def spp_layer(x, num_levels, pool_type='max_pool'):
    """SPPLayer.forward: pyramid of pooled+upsampled maps concat'ed with x (dim=1)."""
    if pool_type not in ('max_pool', 'avg_pool'):
        raise ValueError(f"unsupported pool_type: {pool_type}")
    B, C, H, W = x.shape
    HW = H * W

    levels_geom = [_pool_geometry(H, W, i + 1) for i in range(num_levels)]

    # Stacked flattened bilinear weight maps: one row per pooled cell, per level.
    wmaps, offsets, off = [], [], 0
    for (oh, ow, kh, kw, _rg, _cg) in levels_geom:
        Rh = _bilinear_matrix(H, oh)                      # (H, oh)
        Rw = _bilinear_matrix(W, ow)                      # (W, ow)
        wmaps.append(np.einsum('yr,xs->rsyx', Rh, Rw).reshape(oh * ow, HW))
        offsets.append(off)
        off += oh * ow
    wmap = jnp.asarray(np.concatenate(wmaps, axis=0), dtype=jnp.float32)   # (N_total, HW)

    C_blk = _choose_c_block(C, H, W, num_levels, x.dtype.itemsize)
    n_cb = C // C_blk
    x_flat = x.reshape(B, C, HW)                          # free view in the wrapper

    kernel = _make_spp_kernel(levels_geom, offsets, pool_type)
    out = pl.pallas_call(
        kernel,
        out_shape=jax.ShapeDtypeStruct((B, num_levels + 1, C, HW), x.dtype),
        grid=(B, n_cb),
        in_specs=[
            pl.BlockSpec((None, C_blk, H, W), lambda b, cb: (b, cb, 0, 0)),
            pl.BlockSpec((None, C_blk, HW), lambda b, cb: (b, cb, 0)),
            pl.BlockSpec((wmap.shape[0], HW), lambda b, cb: (0, 0)),
        ],
        out_specs=pl.BlockSpec((None, num_levels + 1, C_blk, HW),
                               lambda b, cb: (b, 0, cb, 0)),
        compiler_params=pltpu.CompilerParams(
            dimension_semantics=("parallel", "parallel"),
            vmem_limit_bytes=32 * 1024 * 1024,
        ),
    )(x, x_flat, wmap)

    # (B, L+1, C, H*W) -> (B, (L+1)*C, H, W): pure metadata reshape; channel order
    # matches torch.cat([level1, ..., levelN, x], dim=1).
    return out.reshape(B, (num_levels + 1) * C, H, W)


def _spp_layer_ref(x, num_levels, pool_type='max_pool'):
    """Independent NumPy reference (dense per-window path) for validation."""
    B, C, H, W = x.shape
    xf = x.astype(np.float32)
    outs = []
    for i in range(num_levels):
        level = i + 1
        oh, ow, kh, kw, row_groups, col_groups = _pool_geometry(H, W, level)
        pooled = np.zeros((B, C, oh, ow), np.float32)
        for r, (rs, re) in enumerate(row_groups):
            for s, (cs, ce) in enumerate(col_groups):
                win = xf[:, :, rs:re, cs:ce]
                if pool_type == 'max_pool':
                    pooled[:, :, r, s] = win.max(axis=(2, 3))
                else:
                    pooled[:, :, r, s] = win.sum(axis=(2, 3)) / float(kh * kw)
        Rh = _bilinear_matrix(H, oh)
        Rw = _bilinear_matrix(W, ow)
        up = np.einsum('bcrs,yr,xs->bcyx', pooled, Rh, Rw)
        outs.append(up.astype(x.dtype))
    outs.append(x)
    return np.concatenate(outs, axis=1)


if __name__ == "__main__":
    key = jax.random.PRNGKey(0)
    B, C, H, W = 2, 4, 16, 16
    num_levels = 3
    x = jax.random.normal(key, (B, C, H, W), dtype=jnp.float32)

    for pool_type in ("max_pool", "avg_pool"):
        out = jax.block_until_ready(spp_layer(x, num_levels, pool_type=pool_type))
        assert out.shape == (B, C * (num_levels + 1), H, W), out.shape
        ref = _spp_layer_ref(np.asarray(x), num_levels, pool_type=pool_type)
        np.testing.assert_allclose(np.asarray(out), ref, rtol=1e-5, atol=1e-5)

    print("KERNEL_OK")
</pallas_src>

<mosaic_0001>
module attributes {stable_mosaic.version = 11 : i64} {
  func.func @kernel(%arg0: i32, %arg1: i32, %arg2: memref<1x4x16x16xf32, #tpu.memory_space<vmem>>, %arg3: memref<1x4x256xf32, #tpu.memory_space<vmem>>, %arg4: memref<14x256xf32, #tpu.memory_space<vmem>>, %arg5: memref<1x4x4x256xf32, #tpu.memory_space<vmem>>) attributes {dimension_semantics = [#tpu.dimension_semantics<parallel>, #tpu.dimension_semantics<parallel>], iteration_bounds = array<i64: 2, 1>, scalar_prefetch = 0 : i64, scratch_operands = 0 : i64, tpu.core_type = #tpu.core_type<tc>, window_params = [{transform_indices = @transform_0, window_bounds = array<i64: 1, 4, 16, 16>}, {transform_indices = @transform_1, window_bounds = array<i64: 1, 4, 256>}, {pipeline_mode = #tpu.pipeline_mode<synchronous>, transform_indices = @transform_2, window_bounds = array<i64: 14, 256>}, {transform_indices = @transform_3, window_bounds = array<i64: 1, 4, 4, 256>}]} {
    %c0 = arith.constant 0 : index
    %c0_0 = arith.constant 0 : index
    %c0_1 = arith.constant 0 : index
    %c0_2 = arith.constant 0 : index
    %0 = vector.load %arg2[%c0, %c0_0, %c0_1, %c0_2] : memref<1x4x16x16xf32, #tpu.memory_space<vmem>>, vector<1x4x16x16xf32>
    %1 = vector.shape_cast %0 : vector<1x4x16x16xf32> to vector<4x16x16xf32>
    %cst = arith.constant dense<0xFF800000> : vector<4x16xf32>
    %2 = vector.multi_reduction <maximumf>, %1, %cst [2] : vector<4x16x16xf32> to vector<4x16xf32>
    %3 = vector.shape_cast %2 : vector<4x16xf32> to vector<4x16x1xf32>
    %cst_3 = arith.constant dense<0xFF800000> : vector<4x1xf32>
    %4 = vector.multi_reduction <maximumf>, %3, %cst_3 [1] : vector<4x16x1xf32> to vector<4x1xf32>
    %c0_4 = arith.constant 0 : index
    %c0_5 = arith.constant 0 : index
    %5 = vector.load %arg4[%c0_4, %c0_5] : memref<14x256xf32, #tpu.memory_space<vmem>>, vector<1x256xf32>
    %cst_6 = arith.constant dense<0.000000e+00> : vector<4x256xf32>
    %6 = tpu.matmul %4, %5, %cst_6 {dimension_numbers = #tpu.dot_dimension_numbers<[1], [0], [0], [1], [0, 0, 1, 1], [], []>} : vector<4x1xf32>, vector<1x256xf32>, vector<4x256xf32> -> vector<4x256xf32>
    %c0_7 = arith.constant 0 : index
    %c0_8 = arith.constant 0 : index
    %c0_9 = arith.constant 0 : index
    %c0_10 = arith.constant 0 : index
    %7 = vector.load %arg5[%c0_7, %c0_8, %c0_9, %c0_10] : memref<1x4x4x256xf32, #tpu.memory_space<vmem>>, vector<1x1x4x256xf32>
    %8 = vector.shape_cast %7 : vector<1x1x4x256xf32> to vector<4x256xf32>
    %9 = vector.shape_cast %6 : vector<4x256xf32> to vector<1x1x4x256xf32>
    tpu.vector_store %arg5[%c0_7, %c0_8, %c0_9, %c0_10], %9 {strides = array<i32>} : memref<1x4x4x256xf32, #tpu.memory_space<vmem>>, vector<1x1x4x256xf32>,
    %10 = vector.extract_strided_slice %1 {offsets = [0, 0, 0], sizes = [4, 16, 8], strides = [1, 1, 1]} : vector<4x16x16xf32> to vector<4x16x8xf32>
    %cst_11 = arith.constant dense<0xFF800000> : vector<4x16xf32>
    %11 = vector.multi_reduction <maximumf>, %10, %cst_11 [2] : vector<4x16x8xf32> to vector<4x16xf32>
    %12 = vector.shape_cast %11 : vector<4x16xf32> to vector<4x16x1xf32>
    %13 = vector.extract_strided_slice %1 {offsets = [0, 0, 8], sizes = [4, 16, 8], strides = [1, 1, 1]} : vector<4x16x16xf32> to vector<4x16x8xf32>
    %cst_12 = arith.constant dense<0xFF800000> : vector<4x16xf32>
    %14 = vector.multi_reduction <maximumf>, %13, %cst_12 [2] : vector<4x16x8xf32> to vector<4x16xf32>
    %15 = vector.shape_cast %14 : vector<4x16xf32> to vector<4x16x1xf32>
    %16 = vector.extract_strided_slice %12 {offsets = [0, 0, 0], sizes = [4, 8, 1], strides = [1, 1, 1]} : vector<4x16x1xf32> to vector<4x8x1xf32>
    %cst_13 = arith.constant dense<0xFF800000> : vector<4x1xf32>
    %17 = vector.multi_reduction <maximumf>, %16, %cst_13 [1] : vector<4x8x1xf32> to vector<4x1xf32>
    %18 = vector.extract_strided_slice %15 {offsets = [0, 0, 0], sizes = [4, 8, 1], strides = [1, 1, 1]} : vector<4x16x1xf32> to vector<4x8x1xf32>
    %cst_14 = arith.constant dense<0xFF800000> : vector<4x1xf32>
    %19 = vector.multi_reduction <maximumf>, %18, %cst_14 [1] : vector<4x8x1xf32> to vector<4x1xf32>
    %20 = vector.extract_strided_slice %12 {offsets = [0, 8, 0], sizes = [4, 8, 1], strides = [1, 1, 1]} : vector<4x16x1xf32> to vector<4x8x1xf32>
    %cst_15 = arith.constant dense<0xFF800000> : vector<4x1xf32>
    %21 = vector.multi_reduction <maximumf>, %20, %cst_15 [1] : vector<4x8x1xf32> to vector<4x1xf32>
    %22 = vector.extract_strided_slice %15 {offsets = [0, 8, 0], sizes = [4, 8, 1], strides = [1, 1, 1]} : vector<4x16x1xf32> to vector<4x8x1xf32>
    %cst_16 = arith.constant dense<0xFF800000> : vector<4x1xf32>
    %23 = vector.multi_reduction <maximumf>, %22, %cst_16 [1] : vector<4x8x1xf32> to vector<4x1xf32>
    %24 = tpu.concatenate %17, %19, %21, %23 in 1 : vector<4x1xf32>, vector<4x1xf32>, vector<4x1xf32>, vector<4x1xf32> -> vector<4x4xf32>
    %c1 = arith.constant 1 : index
    %c0_17 = arith.constant 0 : index
    %25 = vector.load %arg4[%c1, %c0_17] : memref<14x256xf32, #tpu.memory_space<vmem>>, vector<4x256xf32>
    %cst_18 = arith.constant dense<0.000000e+00> : vector<4x256xf32>
    %26 = tpu.matmul %24, %25, %cst_18 {dimension_numbers = #tpu.dot_dimension_numbers<[1], [0], [0], [1], [0, 0, 1, 1], [], []>} : vector<4x4xf32>, vector<4x256xf32>, vector<4x256xf32> -> vector<4x256xf32>
    %c0_19 = arith.constant 0 : index
    %c1_20 = arith.constant 1 : index
    %c0_21 = arith.constant 0 : index
    %c0_22 = arith.constant 0 : index
    %27 = vector.load %arg5[%c0_19, %c1_20, %c0_21, %c0_22] : memref<1x4x4x256xf32, #tpu.memory_space<vmem>>, vector<1x1x4x256xf32>
    %28 = vector.shape_cast %27 : vector<1x1x4x256xf32> to vector<4x256xf32>
    %29 = vector.shape_cast %26 : vector<4x256xf32> to vector<1x1x4x256xf32>
    tpu.vector_store %arg5[%c0_19, %c1_20, %c0_21, %c0_22], %29 {strides = array<i32>} : memref<1x4x4x256xf32, #tpu.memory_space<vmem>>, vector<1x1x4x256xf32>,
    %30 = vector.extract_strided_slice %1 {offsets = [0, 0, 0], sizes = [4, 16, 5], strides = [1, 1, 1]} : vector<4x16x16xf32> to vector<4x16x5xf32>
    %cst_23 = arith.constant dense<0xFF800000> : vector<4x16xf32>
    %31 = vector.multi_reduction <maximumf>, %30, %cst_23 [2] : vector<4x16x5xf32> to vector<4x16xf32>
    %32 = vector.shape_cast %31 : vector<4x16xf32> to vector<4x16x1xf32>
    %33 = vector.extract_strided_slice %1 {offsets = [0, 0, 5], sizes = [4, 16, 6], strides = [1, 1, 1]} : vector<4x16x16xf32> to vector<4x16x6xf32>
    %cst_24 = arith.constant dense<0xFF800000> : vector<4x16xf32>
    %34 = vector.multi_reduction <maximumf>, %33, %cst_24 [2] : vector<4x16x6xf32> to vector<4x16xf32>
    %35 = vector.shape_cast %34 : vector<4x16xf32> to vector<4x16x1xf32>
    %36 = vector.extract_strided_slice %1 {offsets = [0, 0, 11], sizes = [4, 16, 5], strides = [1, 1, 1]} : vector<4x16x16xf32> to vector<4x16x5xf32>
    %cst_25 = arith.constant dense<0xFF800000> : vector<4x16xf32>
    %37 = vector.multi_reduction <maximumf>, %36, %cst_25 [2] : vector<4x16x5xf32> to vector<4x16xf32>
    %38 = vector.shape_cast %37 : vector<4x16xf32> to vector<4x16x1xf32>
    %39 = vector.extract_strided_slice %32 {offsets = [0, 0, 0], sizes = [4, 5, 1], strides = [1, 1, 1]} : vector<4x16x1xf32> to vector<4x5x1xf32>
    %cst_26 = arith.constant dense<0xFF800000> : vector<4x1xf32>
    %40 = vector.multi_reduction <maximumf>, %39, %cst_26 [1] : vector<4x5x1xf32> to vector<4x1xf32>
    %41 = vector.extract_strided_slice %35 {offsets = [0, 0, 0], sizes = [4, 5, 1], strides = [1, 1, 1]} : vector<4x16x1xf32> to vector<4x5x1xf32>
    %cst_27 = arith.constant dense<0xFF800000> : vector<4x1xf32>
    %42 = vector.multi_reduction <maximumf>, %41, %cst_27 [1] : vector<4x5x1xf32> to vector<4x1xf32>
    %43 = vector.extract_strided_slice %38 {offsets = [0, 0, 0], sizes = [4, 5, 1], strides = [1, 1, 1]} : vector<4x16x1xf32> to vector<4x5x1xf32>
    %cst_28 = arith.constant dense<0xFF800000> : vector<4x1xf32>
    %44 = vector.multi_reduction <maximumf>, %43, %cst_28 [1] : vector<4x5x1xf32> to vector<4x1xf32>
    %45 = vector.extract_strided_slice %32 {offsets = [0, 5, 0], sizes = [4, 6, 1], strides = [1, 1, 1]} : vector<4x16x1xf32> to vector<4x6x1xf32>
    %cst_29 = arith.constant dense<0xFF800000> : vector<4x1xf32>
    %46 = vector.multi_reduction <maximumf>, %45, %cst_29 [1] : vector<4x6x1xf32> to vector<4x1xf32>
    %47 = vector.extract_strided_slice %35 {offsets = [0, 5, 0], sizes = [4, 6, 1], strides = [1, 1, 1]} : vector<4x16x1xf32> to vector<4x6x1xf32>
    %cst_30 = arith.constant dense<0xFF800000> : vector<4x1xf32>
    %48 = vector.multi_reduction <maximumf>, %47, %cst_30 [1] : vector<4x6x1xf32> to vector<4x1xf32>
    %49 = vector.extract_strided_slice %38 {offsets = [0, 5, 0], sizes = [4, 6, 1], strides = [1, 1, 1]} : vector<4x16x1xf32> to vector<4x6x1xf32>
    %cst_31 = arith.constant dense<0xFF800000> : vector<4x1xf32>
    %50 = vector.multi_reduction <maximumf>, %49, %cst_31 [1] : vector<4x6x1xf32> to vector<4x1xf32>
    %51 = vector.extract_strided_slice %32 {offsets = [0, 11, 0], sizes = [4, 5, 1], strides = [1, 1, 1]} : vector<4x16x1xf32> to vector<4x5x1xf32>
    %cst_32 = arith.constant dense<0xFF800000> : vector<4x1xf32>
    %52 = vector.multi_reduction <maximumf>, %51, %cst_32 [1] : vector<4x5x1xf32> to vector<4x1xf32>
    %53 = vector.extract_strided_slice %35 {offsets = [0, 11, 0], sizes = [4, 5, 1], strides = [1, 1, 1]} : vector<4x16x1xf32> to vector<4x5x1xf32>
    %cst_33 = arith.constant dense<0xFF800000> : vector<4x1xf32>
    %54 = vector.multi_reduction <maximumf>, %53, %cst_33 [1] : vector<4x5x1xf32> to vector<4x1xf32>
    %55 = vector.extract_strided_slice %38 {offsets = [0, 11, 0], sizes = [4, 5, 1], strides = [1, 1, 1]} : vector<4x16x1xf32> to vector<4x5x1xf32>
    %cst_34 = arith.constant dense<0xFF800000> : vector<4x1xf32>
    %56 = vector.multi_reduction <maximumf>, %55, %cst_34 [1] : vector<4x5x1xf32> to vector<4x1xf32>
    %57 = tpu.concatenate %40, %42, %44, %46, %48, %50, %52, %54, %56 in 1 : vector<4x1xf32>, vector<4x1xf32>, vector<4x1xf32>, vector<4x1xf32>, vector<4x1xf32>, vector<4x1xf32>, vector<4x1xf32>, vector<4x1xf32>, vector<4x1xf32> -> vector<4x9xf32>
    %c5 = arith.constant 5 : index
    %c0_35 = arith.constant 0 : index
    %58 = vector.load %arg4[%c5, %c0_35] : memref<14x256xf32, #tpu.memory_space<vmem>>, vector<9x256xf32>
    %cst_36 = arith.constant dense<0.000000e+00> : vector<4x256xf32>
    %59 = tpu.matmul %57, %58, %cst_36 {dimension_numbers = #tpu.dot_dimension_numbers<[1], [0], [0], [1], [0, 0, 1, 1], [], []>} : vector<4x9xf32>, vector<9x256xf32>, vector<4x256xf32> -> vector<4x256xf32>
    %c0_37 = arith.constant 0 : index
    %c2 = arith.constant 2 : index
    %c0_38 = arith.constant 0 : index
    %c0_39 = arith.constant 0 : index
    %60 = vector.load %arg5[%c0_37, %c2, %c0_38, %c0_39] : memref<1x4x4x256xf32, #tpu.memory_space<vmem>>, vector<1x1x4x256xf32>
    %61 = vector.shape_cast %60 : vector<1x1x4x256xf32> to vector<4x256xf32>
    %62 = vector.shape_cast %59 : vector<4x256xf32> to vector<1x1x4x256xf32>
    tpu.vector_store %arg5[%c0_37, %c2, %c0_38, %c0_39], %62 {strides = array<i32>} : memref<1x4x4x256xf32, #tpu.memory_space<vmem>>, vector<1x1x4x256xf32>,
    %c0_40 = arith.constant 0 : index
    %c0_41 = arith.constant 0 : index
    %c0_42 = arith.constant 0 : index
    %63 = vector.load %arg3[%c0_40, %c0_41, %c0_42] : memref<1x4x256xf32, #tpu.memory_space<vmem>>, vector<1x4x256xf32>
    %64 = vector.shape_cast %63 : vector<1x4x256xf32> to vector<4x256xf32>
    %c0_43 = arith.constant 0 : index
    %c3 = arith.constant 3 : index
    %c0_44 = arith.constant 0 : index
    %c0_45 = arith.constant 0 : index
    %65 = vector.load %arg5[%c0_43, %c3, %c0_44, %c0_45] : memref<1x4x4x256xf32, #tpu.memory_space<vmem>>, vector<1x1x4x256xf32>
    %66 = vector.shape_cast %65 : vector<1x1x4x256xf32> to vector<4x256xf32>
    %67 = vector.shape_cast %64 : vector<4x256xf32> to vector<1x1x4x256xf32>
    tpu.vector_store %arg5[%c0_43, %c3, %c0_44, %c0_45], %67 {strides = array<i32>} : memref<1x4x4x256xf32, #tpu.memory_space<vmem>>, vector<1x1x4x256xf32>,
    return
  }
  func.func @transform_0(%arg0: i32, %arg1: i32) -> (i32, i32, i32, i32) {
    %c0_i32 = arith.constant 0 : i32
    %c0_i32_0 = arith.constant 0 : i32
    %c0_i32_1 = arith.constant 0 : i32
    return %arg0, %arg1, %c0_i32, %c0_i32_0 : i32, i32, i32, i32
  }
  func.func @transform_1(%arg0: i32, %arg1: i32) -> (i32, i32, i32) {
    %c0_i32 = arith.constant 0 : i32
    %c0_i32_0 = arith.constant 0 : i32
    return %arg0, %arg1, %c0_i32 : i32, i32, i32
  }
  func.func @transform_2(%arg0: i32, %arg1: i32) -> (i32, i32) {
    %c0_i32 = arith.constant 0 : i32
    %c0_i32_0 = arith.constant 0 : i32
    %c0_i32_1 = arith.constant 0 : i32
    return %c0_i32, %c0_i32_0 : i32, i32
  }
  func.func @transform_3(%arg0: i32, %arg1: i32) -> (i32, i32, i32, i32) {
    %c0_i32 = arith.constant 0 : i32
    %c0_i32_0 = arith.constant 0 : i32
    %c0_i32_1 = arith.constant 0 : i32
    return %arg0, %c0_i32, %arg1, %c0_i32_0 : i32, i32, i32, i32
  }
}

</mosaic_0001>

<bundles_post_ra>
// kernel: tpu_custom_call.1
= control target key start
LH: loop header
LB: loop body
LE: loop exit
PB: predicated region body
PF: predicated region fallthrough
CT: control target
= control target key end

     0   :  { %s2351_s0 = inlined_call_operand.hbm [shape: f32[2,4,16,16], index: 0, kind: input, shape index: {}]   ;;  %s2352_s1 = inlined_call_operand.hbm [shape: f32[2,4,256], index: 1, kind: input, shape index: {}]   ;;  %s2353_s2 = inlined_call_operand.hbm [shape: f32[14,256], index: 2, kind: input, shape index: {}]   ;;  %s2354_s3 = inlined_call_operand.hbm [shape: f32[2,4,4,256], index: 3, kind: output, shape index: {}]  }
   0x1   :  { %2357 = sst [smem:[#allocation16_spill]] %s2351_s0 }
   0x2   :  { %2358 = sst [smem:[#allocation17_spill]] %s2353_s2 }
   0x3   :  { %8 = vsyncpa [#allocation3], 0 }
   0x4   :  { %10 = vsyncpa [#allocation3 + $0x1], 0 }
   0x5   :  { %11 = vsyncpa [#allocation6], 0 }
   0x6   :  { %13 = vsyncpa [#allocation6 + $0x1], 0 }
   0x7   :  { %14 = vsyncpa [#allocation4], 0 }
   0x8   :  { %16 = vsyncpa [#allocation4 + $0x1], 0  ;;  %s1708_s12 = smov 0   ;;  %s1710_s13 = smov 0  }
   0x9   :  { %s1712_s14 = smov 0   ;;  %s1714_s15 = smov 0  }
   0xa   :  { %s1716_s16 = smov 0   ;;  %s1718_s17 = smov 0  }
   0xb LB: > { %2359 = sst [smem:[#allocation13_spill]] %s1663_s14  ;;  %s1739_s18 = sadd.s32 4294967295, %s1675_s17   ;;  %s1675_s17 = sphi %s1718_s17, %s22_s17   ;;  %s1671_s16 = sphi %s1716_s16, %s2379_s16   ;;  %s1667_s15 = sphi %s1714_s15, %s2378_s15   ;;  %s1663_s14 = sphi %s1712_s14, %s2374_s14   ;;  %s1659_s13 = sphi %s1710_s13, %s2377_s13   ;;  %s1655_s12 = sphi %s1708_s12, %s2376_s12  }
   0xc   : > { %s1385_s19 = sadd.s32 4294967294, %s1675_s17   ;;  %p56_p0 = scmp.ne.s32.totalorder %s1659_s13, %s1655_s12 }
   0xd   : > { %p57_p1 = scmp.eq.s32.totalorder %s1739_s18, 0  ;;  %p137_p3 = scmp.eq.s32.totalorder %s1385_s19, 1 }
   0xe   : > { %p1386_p5 = scmp.ge.s32.totalorder %s1675_s17, 1  ;;  %p144_p7 = scmp.lt.s32.totalorder %s1675_s17, 3 }
   0xf   : > { %p1748_p4 = por %p57_p1, %p56_p0  ;;  %p1753_p6 = por %p137_p3, %p56_p0 }
  0x10   : > { %p1758_p8 = pnand %p1386_p5, %p144_p7  ;;  %s1677_s23 = smov [#allocation7]  }
  0x11   : > { %s2361_s21 = scalar_select %p1753_p6, 1, 0 }
  0x12   : > { %s156_s24 = sshll.u32 %s1677_s23, 4  ;;  %p1430_p9 = pneg %p1758_p8  ;;  %s157_s24 = int_to_ptr.vmem [resolvable:$true] %s156_s24 }
  0x13   : > { %p1388_p10 = scmp.ge.s32.totalorder %s1675_s17, 2  ;;  %s34_s26 = sadd.s32 1, %s1671_s16 }
  0x14   : > { %p1767_p11 = pnand %p1430_p9, %p57_p1  ;;  %s1516_s27 = scalar_lea.vmem %s157_s24, 512 }
  0x15   : > { %p1517_p13 = scmp.ne.s32.totalorder %s157_s24, %s1516_s27  ;;  %p1524_p5 = scmp.lt.s32.totalorder %s157_s24, %s157_s24 }
  0x16   : > { %p1507_p12 = pneg %p1767_p11  ;;  %p1525_p7 = scmp.lt.s32.totalorder %s1516_s27, %s1516_s27 }
  0x18   : > { %p1519_p0 = pnand %p1517_p13, %p1507_p12  ;;  %p1526_p2 = por %p1525_p7, %p1524_p5 }
  0x1a   : > { %p1520_p3 = pneg %p1519_p0 }
  0x1c   : > { %p1527_p6 = pnand %p1526_p2, %p1520_p3 }
  0x1e   : > { %1530 = shalt.err (!%p1527_p6)
}
  0x1f   : > { %s1678_s28 = smov 256   ;;  %s1679_s29 = smov 16  }
  0x20   : > { %s2364_s2 = sld [smem:[#allocation17_spill]]  ;;  %p36_p2 = scmp.ge.s32.totalorder %s34_s26, 2 }
  0x21   : > { %s43_s5 = sadd.s32 1, %s1663_s14  ;;  %p50_p6 = scmp.ne.s32.totalorder %s1663_s14, %s1659_s13 }
  0x22   : > { %p51_p9 = scmp.eq.s32.totalorder %s1675_s17, 0  ;;  %s2381_s26 = smov (%p36_p2, %s34_s26), 0 }
  0x23   : > { %2365 = sst [smem:[#allocation14_spill]] %s2381_s26  ;;  %p2367_p13 = scmp.eq.s32.totalorder %s1739_s18, 1 }
  0x24   : > { %p1785_p12 = por %p51_p9, %p50_p6  ;;  %s38_s8 = ssub.s32 %s1671_s16, %s2381_s26 }
  0x25   : > { %p1791_p0 = por %p2367_p13, %p50_p6  ;;  %p41_p3 = scmp.eq.s32.totalorder %s38_s8, 0 }
  0x26   : > { %1433 = dma.hbm_to_vmem [thread:$0]  (!%p1767_p11), %s2364_s2, 512, %s157_s24, [#allocation6], %s1678_s28, %s1678_s28, %s1679_s29  }
  0x27   : > { %p1446_p11 = scmp.lt.s32.totalorder %s1675_s17, 2  ;;  %s1799_s9 = sand.u32 1, %s1663_s14  }
  0x28   : > { %s1389_s10 = sshll.u32 %s1799_s9, 6  ;;  %s1417_s19 = sshll.u32 %s1671_s16, 10 }
  0x29   : > { %s1803_s11 = scalar_select %p41_p3, %s1663_s14, %s43_s5  }
  0x2a   : > { %s2370_s0 = sld [smem:[#allocation16_spill]]  ;;  %s174_s27 = scalar_lea.vmem [#allocation2], %s1389_s10 }
  0x2b   : > { %2369 = sst [smem:[#allocation15_spill]] %s1803_s11  ;;  %s184_s28 = sshll.u32 %s174_s27, 4  ;;  %s185_s28 = int_to_ptr.vmem [resolvable:$true] %s184_s28 }
  0x2c   : > { %p1811_p5 = pnand %p1446_p11, %p1785_p12  ;;  %s194_s30 = sand.u32 1, %s1675_s17  }
  0x2d   : > { %s171_s4 = scalar_lea.sflag [#allocation3], %s1799_s9  ;;  %s1544_s5 = scalar_lea.vmem %s185_s28, 1024 }
  0x2e   : > { %p1533_p7 = pneg %p1811_p5  ;;  %p1545_p2 = scmp.ne.s32.totalorder %s185_s28, %s1544_s5 }
  0x2f   : > { %s1680_s8 = smov [#allocation2]  }
  0x30   : > { %s183_s25 = scalar_lea.hbm %s2370_s0, %s1417_s19  ;;  %p1547_p6 = pnand %p1545_p2, %p1533_p7 }
  0x31   : > { %s1549_s10 = sshll.u32 %s1680_s8, 4  ;;  %s1550_s10 = int_to_ptr.vmem [resolvable:$false] %s1549_s10 }
  0x32   : > { %p1548_p9 = pneg %p1547_p6  ;;  %s1551_s6 = scalar_lea.vmem %s1550_s10, 2048 }
  0x33   : > { %p1552_p12 = scmp.lt.s32.totalorder %s185_s28, %s1550_s10  ;;  %p1553_p13 = scmp.lt.s32.totalorder %s1551_s6, %s1544_s5 }
  0x35   : > { %p1554_p11 = por %p1553_p13, %p1552_p12 }
  0x37   : > { %p1555_p3 = pnand %p1554_p11, %p1548_p9 }
  0x39   : > { %1558 = shalt.err (!%p1555_p3)
}
  0x3a   : > { %s1681_s19 = smov 128   ;;  %s1682_s23 = smov 8  }
  0x3b   : > { %1437 = dma.hbm_to_vmem [thread:$0]  (!%p1811_p5), %s183_s25, 1024, %s185_s28, %s171_s4, %s1681_s19, %s1681_s19, %s1682_s23  }
  0x3c   : > { %s1392_s24 = sshll.u32 %s1799_s9, 3  ;;  %s1418_s27 = sshll.u32 %s1671_s16, 7 }
  0x3d   : > { %s206_s8 = scalar_lea.hbm %s2352_s1, %s1418_s27  ;;  %s198_s26 = scalar_lea.vmem [#allocation5], %s1392_s24 }
  0x3e   : > { %s208_s10 = sshll.u32 %s198_s26, 4  ;;  %s195_s5 = scalar_lea.sflag [#allocation6], %s194_s30  ;;  %s209_s10 = int_to_ptr.vmem [resolvable:$true] %s208_s10 }
  0x3f   : > { %s1572_s6 = scalar_lea.vmem %s209_s10, 128  ;;  %s1683_s11 = smov [#allocation5]  }
  0x40   : > { %p1573_p2 = scmp.ne.s32.totalorder %s209_s10, %s1572_s6  ;;  %s1577_s14 = sshll.u32 %s1683_s11, 4  ;;  %s1578_s14 = int_to_ptr.vmem [resolvable:$false] %s1577_s14 }
  0x41   : > { %s1579_s25 = scalar_lea.vmem %s1578_s14, 256  ;;  %p1580_p12 = scmp.lt.s32.totalorder %s209_s10, %s1578_s14 }
  0x42   : > { %p1575_p6 = pnand %p1573_p2, %p1533_p7  ;;  %p1581_p13 = scmp.lt.s32.totalorder %s1579_s25, %s1572_s6 }
  0x44   : > { %p1576_p9 = pneg %p1575_p6  ;;  %p1582_p11 = por %p1581_p13, %p1580_p12 }
  0x46   : > { %p1583_p3 = pnand %p1582_p11, %p1576_p9 }
  0x48   : > { %1586 = shalt.err (!%p1583_p3)
}
  0x49   : > { %1440 = dma.hbm_to_vmem [thread:$0]  (!%p1811_p5), %s206_s8, 128, %s209_s10, %s195_s5  }
  0x4a   : > { %217 = sbr.rel (%p1758_p8) target bundleno = 557 (0x22d), region = 32  ;;  %s1837_s0 = sand.u32 (!%p1758_p8), 1, %s1659_s13  }
  0x4b   : > { %s1396_s2 = sshll.u32 (!%p1758_p8), %s1837_s0, 6  ;;  %s220_s26 = scalar_lea.sflag (!%p1758_p8), [#allocation3], %s1837_s0 }
  0x4c   : > { %s1841_s9 = scalar_lea.vmem (!%p1758_p8), [#allocation2], %s1396_s2 }
  0x4f   : > { %1638 = dma.done.wait (%p1748_p4), %s220_s26, 1024  }
  0x50   : > { %1640 = vsyncadd (%p1748_p4), %s220_s26, 4294966272  ;;  %s228_s14 = sand.u32 1, %s1739_s18   ;;  %s1397_s22 = sshll.u32 %s1837_s0, 3 }
  0x51   : > { %s229_s11 = scalar_lea.sflag [#allocation6], %s228_s14  ;;  %s1849_s28 = scalar_lea.vmem [#allocation5], %s1397_s22 }
  0x52   : > { %1642 = dma.done.wait (%p1748_p4), %s229_s11, 128  }
  0x53   : > { %1644 = vsyncadd (%p1748_p4), %s229_s11, 4294967168 }
  0x54   : > { %1646 = dma.done.wait (%p57_p1), [#allocation6], 512  }
  0x55   : > { %1648 = vsyncadd (%p57_p1), [#allocation6], 4294966784  ;;  %vm705_vm0 = vcmask 39936   ;;  %v1860_v0 = vld [vmem:[%s1841_s9 + $0x10] sm:$0xff]  ;;  %v1863_v1 = vld [vmem:[%s1841_s9] sm:$0xff]  ;;  %vm730_vm1 = vcmask 89128   ;;  %v338_v56 = vlaneseq }
  0x56   : > { %v1866_v2 = vld [vmem:[%s1841_s9 + $0x18] sm:$0xff]  ;;  %v712_v3 = vsel %vm705_vm0, %v1860_v0, -inf  ;;  %v706_v4 = vsel %vm705_vm0, %v1863_v1, -inf  ;;  %v1873_v5 = vld [vmem:[%s1841_s9 + $0x8] sm:$0xff]  ;;  %v737_v8 = vsel %vm730_vm1, %v1860_v0, -inf  ;;  %v731_v9 = vsel %vm730_vm1, %v1863_v1, -inf }
  0x57   : > { %713 = vmax.xlane.f32.xlu1 %v712_v3  ;;  %707 = vmax.xlane.f32.xlu0 %v706_v4  ;;  %v715_v6 = vsel %vm705_vm0, %v1866_v2, -inf  ;;  %v709_v7 = vsel %vm705_vm0, %v1873_v5, -inf  ;;  %v1884_v10 = vld [vmem:[%s1841_s9 + $0x28] sm:$0xff]  ;;  %v1887_v11 = vld [vmem:[%s1841_s9 + $0x20] sm:$0xff]  ;;  %v740_v14 = vsel %vm730_vm1, %v1866_v2, -inf  ;;  %v734_v15 = vsel %vm730_vm1, %v1873_v5, -inf }
  0x58   : > { %v721_v12 = vsel %vm705_vm0, %v1884_v10, -inf  ;;  %v718_v13 = vsel %vm705_vm0, %v1887_v11, -inf  ;;  %vm755_vm2 = vcmask 130136   ;;  %v743_v17 = vsel %vm730_vm1, %v1887_v11, -inf  ;;  %v1902_v18 = vld [vmem:[%s1841_s9 + $0x30] sm:$0xff]  ;;  %v1909_v21 = vld [vmem:[%s1841_s9 + $0x38] sm:$0xff] }
  0x59   : > { %v756_v16 = vsel %vm755_vm2, %v1863_v1, -inf  ;;  %v724_v19 = vsel %vm705_vm0, %v1902_v18, -inf  ;;  %v762_v20 = vsel %vm755_vm2, %v1860_v0, -inf  ;;  %v746_v22 = vsel %vm730_vm1, %v1884_v10, -inf  ;;  %v1979_v63 = vld [vmem:[#allocation7 + $0x18] sm:$0x3f] }
  0x5a   : > { %v727_v23 = vsel %vm705_vm0, %v1909_v21, -inf  ;;  %v759_v24 = vsel %vm755_vm2, %v1873_v5, -inf  ;;  %v749_v25 = vsel %vm730_vm1, %v1902_v18, -inf  ;;  %v768_v26 = vsel %vm755_vm2, %v1887_v11, -inf  ;;  %v613_v3 = vld [vmem:[#allocation7] sm:$0x1e] }
  0x5b   : > { %716 = vmax.xlane.f32.xlu1 %v715_v6  ;;  %710 = vmax.xlane.f32.xlu0 %v709_v7  ;;  %v765_v27 = vsel %vm755_vm2, %v1866_v2, -inf  ;;  %vm273_vm3 = vcmask 130048   ;;  %v771_v32 = vsel %vm755_vm2, %v1884_v10, -inf  ;;  %v752_v33 = vsel %vm730_vm1, %v1909_v21, -inf  ;;  %s1399_s18 = sshll.u32 %s1837_s0, 5  ;;  %s1419_s30 = sshll.u32 %s1667_s15, 9 }
  0x5c   : > { %v277_v28 = vsel %vm273_vm3, %v1873_v5, -inf  ;;  %v274_v29 = vsel %vm273_vm3, %v1863_v1, -inf  ;;  %v283_v30 = vsel %vm273_vm3, %v1866_v2, -inf  ;;  %v280_v31 = vsel %vm273_vm3, %v1860_v0, -inf  ;;  %s263_s20 = scalar_lea.vmem [#allocation8], %s1399_s18  ;;  %s2303_s23 = scalar_lea.hbm %s2354_s3, %s1419_s30 }
  0x5d   : > { %v286_v34 = vsel %vm273_vm3, %v1887_v11, -inf  ;;  %v774_v35 = vsel %vm755_vm2, %v1902_v18, -inf  ;;  %v777_v36 = vsel %vm755_vm2, %v1909_v21, -inf  ;;  %v289_v37 = vsel %vm273_vm3, %v1884_v10, -inf  ;;  %s1262_s29 = sshll.u32 %s263_s20, 4  ;;  %s1247_s24 = scalar_lea.sflag [#allocation4], %s1837_s0  ;;  %s2298_s29 = int_to_ptr.vmem [resolvable:$true] %s1262_s29 }
  0x5e   : > { %v295_v38 = vsel %vm273_vm3, %v1909_v21, -inf  ;;  %v292_v39 = vsel %vm273_vm3, %v1902_v18, -inf  ;;  %vm430_vm4 = vcmask 64512   ;;  %vm455_vm5 = vcmask 130112   ;;  %s1587_s27 = scalar_lea.vmem %s2298_s29, 512  ;;  %s1685_s15 = smov [#allocation8]  }
  0x5f   : > { %738 = vmax.xlane.f32.xlu1 %v737_v8  ;;  %732 = vmax.xlane.f32.xlu0 %v731_v9  ;;  %v437_v40 = vsel %vm430_vm4, %v1860_v0, -inf  ;;  %v431_v41 = vsel %vm430_vm4, %v1863_v1, -inf  ;;  %v462_v42 = vsel %vm455_vm5, %v1860_v0, -inf  ;;  %v456_v43 = vsel %vm455_vm5, %v1863_v1, -inf  ;;  %p1588_p1 = scmp.ne.s32.totalorder %s2298_s29, %s1587_s27  ;;  %s1591_s8 = sshll.u32 %s1685_s15, 4  ;;  %s1592_s8 = int_to_ptr.vmem [resolvable:$false] %s1591_s8 }
  0x60   : > { %v440_v44 = vsel %vm430_vm4, %v1866_v2, -inf  ;;  %v434_v45 = vsel %vm430_vm4, %v1873_v5, -inf  ;;  %v468_v46 = vsel %vm455_vm5, %v1887_v11, -inf  ;;  %v443_v47 = vsel %vm430_vm4, %v1887_v11, -inf  ;;  %s1593_s10 = scalar_lea.vmem %s1592_s8, 1024  ;;  %p1594_p5 = scmp.lt.s32.totalorder %s2298_s29, %s1592_s8 }
  0x61   : > { %v449_v48 = vsel %vm430_vm4, %v1902_v18, -inf  ;;  %v446_v49 = vsel %vm430_vm4, %v1884_v10, -inf  ;;  %v465_v50 = vsel %vm455_vm5, %v1866_v2, -inf  ;;  %v459_v51 = vsel %vm455_vm5, %v1873_v5, -inf  ;;  %v614_v2 = vld [vmem:[#allocation7 + $0x8] sm:$0x1e]  ;;  %p1589_p4 = pnand %p1588_p1, %p1791_p0  ;;  %p1595_p7 = scmp.lt.s32.totalorder %s1593_s10, %s1587_s27 }
  0x62   : > { %v452_v52 = vsel %vm430_vm4, %v1909_v21, -inf  ;;  %v474_v53 = vsel %vm455_vm5, %v1902_v18, -inf  ;;  %v477_v54 = vsel %vm455_vm5, %v1909_v21, -inf  ;;  %v471_v55 = vsel %vm455_vm5, %v1884_v10, -inf }
  0x63   : > { %722 = vmax.xlane.f32.xlu1 %v721_v12  ;;  %719 = vmax.xlane.f32.xlu0 %v718_v13  ;;  %v339_v57 = vshrl.u32 %v338_v56, 7  ;;  %v326_v59 = vld [vmem:[#allocation7] ss:$8 sm:$0x3]  ;;  %vm349_vm6 = vcmask 1040384   ;;  %v1154_v0 = vrot.slane %v1979_v63, 5  ;;  %p1590_p8 = pneg %p1589_p4  ;;  %p1596_p2 = por %p1595_p7, %p1594_p5 }
  0x64   : > { %v1684_v1 = vmov 0.0   ;;  %vm623_vm7 = vcmask 1043456   ;;  %v618_v4 = vrot.slane %v614_v2, 1  ;;  %v617_v5 = vrot.slane %v613_v3, 1 }
  0x65   : > { %v344_v58 = vsub.s32 1, %v339_v57  ;;  %v340_v60 = vsub.s32 0, %v339_v57  ;;  %418 = vmatprep.mubr.f32.mxu0 %v1684_v1  ;;  %692 = vmatprep.mubr.f32.mxu1 %v1684_v1  ;;  %vm780_vm8 = vcmask 1044480   ;;  %vm865_vm9 = vcmask 1047557   ;;  %p1597_p6 = pnand %p1596_p2, %p1590_p8 }
  0x66   : > { %1403 = vmatprep.subr.msk.mxu1 %vm623_vm7, %v618_v4  ;;  %vm867_vm10 = vcmask 1042432   ;;  %vm975_vm11 = vcmask 1047555   ;;  %vm331_vm12 = vcmask 1041409   ;;  %vm333_vm13 = vcmask 1042434  }
  0x67   : > { %741 = vmax.xlane.f32.xlu1 %v740_v14  ;;  %735 = vmax.xlane.f32.xlu0 %v734_v15  ;;  %v345_v61 = vrot.slane %v326_v59, %v344_v58  ;;  %v341_v62 = vrot.slane %v326_v59, %v340_v60  ;;  %vm335_vm14 = vcmask 1043459   ;;  %vm346_vm15 = vcmask 7168  }
  0x68   : > { %1404 = vmatpush1.msk.msra.mxu1 %vm623_vm7, %v617_v5  ;;  %vm609_vm1 = vcmask 15360   ;;  %vm611_vm2 = vcmask 23552   ;;  %vm619_vm3 = vcmask 31744   ;;  %vm1137_vm5 = vcmask 48128  }
  0x69   : > { %1400 = vmatprep.subr.msk.mxu0 %vm349_vm6, %v345_v61  ;;  %vm1139_vm7 = vcmask 56320  }
  0x6a   : > { %1401 = vmatpush1.msk.msra.mxu0 %vm349_vm6, %v341_v62 }
  0x6b   : > { %757 = vmax.xlane.f32.xlu1 %v756_v16  ;;  %744 = vmax.xlane.f32.xlu0 %v743_v17 }
  0x6c   : > { %1407 = vmatprep.subr.msk.mxu0 %vm349_vm6, %v1154_v0 }
  0x6f   : > { %725 = vmax.xlane.f32.xlu1 %v724_v19  ;;  %763 = vmax.xlane.f32.xlu0 %v762_v20 }
  0x73   : > { %747 = vmax.xlane.f32.xlu1 %v746_v22  ;;  %728 = vmax.xlane.f32.xlu0 %v727_v23 }
  0x77   : > { %760 = vmax.xlane.f32.xlu1 %v759_v24  ;;  %750 = vmax.xlane.f32.xlu0 %v749_v25 }
  0x7b   : > { %769 = vmax.xlane.f32.xlu1 %v768_v26  ;;  %766 = vmax.xlane.f32.xlu0 %v765_v27 }
  0x7f   : > { %278 = vmax.xlane.f32.xlu1 %v277_v28  ;;  %275 = vmax.xlane.f32.xlu0 %v274_v29 }
  0x83   : > { %284 = vmax.xlane.f32.xlu1 %v283_v30  ;;  %281 = vmax.xlane.f32.xlu0 %v280_v31 }
  0x87   : > { %772 = vmax.xlane.f32.xlu1 %v771_v32  ;;  %753 = vmax.xlane.f32.xlu0 %v752_v33 }
  0x8b   : > { %287 = vmax.xlane.f32.xlu1 %v286_v34  ;;  %775 = vmax.xlane.f32.xlu0 %v774_v35 }
  0x8f   : > { %778 = vmax.xlane.f32.xlu1 %v777_v36  ;;  %290 = vmax.xlane.f32.xlu0 %v289_v37  ;;  %v1998_v37 = vld [vmem:[#allocation7 + $0x10] sm:$0x3f] }
  0x93   : > { %296 = vmax.xlane.f32.xlu1 %v295_v38  ;;  %293 = vmax.xlane.f32.xlu0 %v292_v39 }
  0x97   : > { %438 = vmax.xlane.f32.xlu1 %v437_v40  ;;  %432 = vmax.xlane.f32.xlu0 %v431_v41 }
  0x9b   : > { %463 = vmax.xlane.f32.xlu1 %v462_v42  ;;  %457 = vmax.xlane.f32.xlu0 %v456_v43  ;;  %v2001_v42 = vld [vmem:[#allocation7 + $0x8] sm:$0xe0] }
  0x9f   : > { %441 = vmax.xlane.f32.xlu1 %v440_v44  ;;  %435 = vmax.xlane.f32.xlu0 %v434_v45 }
  0xa3   : > { %469 = vmax.xlane.f32.xlu1 %v468_v46  ;;  %444 = vmax.xlane.f32.xlu0 %v443_v47 }
  0xa7   : > { %450 = vmax.xlane.f32.xlu1 %v449_v48  ;;  %447 = vmax.xlane.f32.xlu0 %v446_v49 }
  0xab   : > { %466 = vmax.xlane.f32.xlu1 %v465_v50  ;;  %460 = vmax.xlane.f32.xlu0 %v459_v51 }
  0xaf   : > { %453 = vmax.xlane.f32.xlu1 %v452_v52  ;;  %475 = vmax.xlane.f32.xlu0 %v474_v53  ;;  %v1151_v52 = vrot.slane %v1998_v37, 5  ;;  %v1153_v53 = vrot.slane %v2001_v42, 5 }
  0xb3   : > { %478 = vmax.xlane.f32.xlu1 %v477_v54  ;;  %472 = vmax.xlane.f32.xlu0 %v471_v55 }
  0xe0   : > { %v714_v6 = vpop.xlane.xlu1 %713  ;;  %v708_v7 = vpop.xlane.xlu0 %707 }
  0xe1   : > { %v788_v8 = vsel %vm780_vm8, %v714_v6, -inf  ;;  %v781_v9 = vsel %vm780_vm8, %v708_v7, -inf  ;;  %v876_v12 = vsel %vm865_vm9, %v714_v6, -inf  ;;  %v866_v13 = vsel %vm865_vm9, %v708_v7, -inf }
  0xe2   : > { %v789_v10 = vrot.slane %v788_v8, 4  ;;  %v782_v11 = vrot.slane %v781_v9, 4 }
  0xe4   : > { %v717_v14 = vpop.xlane.xlu1 %716  ;;  %v711_v15 = vpop.xlane.xlu0 %710  ;;  %v790_v20 = vmax.f32 %v788_v8, %v789_v10  ;;  %v783_v21 = vmax.f32 %v781_v9, %v782_v11 }
  0xe5   : > { %v877_v16 = vsel %vm867_vm10, %v717_v14, -inf  ;;  %v983_v17 = vsel %vm975_vm11, %v717_v14, -inf  ;;  %v868_v18 = vsel %vm867_vm10, %v711_v15, -inf  ;;  %v976_v19 = vsel %vm975_vm11, %v711_v15, -inf }
  0xe6   : > { %v878_v22 = vmax.f32 %v876_v12, %v877_v16  ;;  %v984_v23 = vrot.slane %v983_v17, 4  ;;  %v869_v24 = vmax.f32 %v866_v13, %v868_v18  ;;  %v977_v25 = vrot.slane %v976_v19, 4 }
  0xe7   : > { %v791_v33 = vrot.slane %v790_v20, 2  ;;  %v784_v34 = vrot.slane %v783_v21, 2 }
  0xe8   : > { %v879_v26 = vrot.slane %v878_v22, 4  ;;  %v985_v27 = vmax.f32 %v983_v17, %v984_v23  ;;  %v739_v28 = vpop.xlane.xlu1 %738  ;;  %v733_v29 = vpop.xlane.xlu0 %732  ;;  %v870_v30 = vrot.slane %v869_v24, 4  ;;  %v978_v31 = vmax.f32 %v976_v19, %v977_v25 }
  0xe9   : > { %v816_v32 = vsel %vm780_vm8, %v739_v28, -inf  ;;  %v809_v41 = vsel %vm780_vm8, %v733_v29, -inf  ;;  %v2003_v50 = vmax.f32 %v790_v20, %v791_v33  ;;  %v785_v54 = vmax.f32 %v783_v21, %v784_v34 }
  0xea   : > { %v880_v35 = vmax.f32 %v878_v22, %v879_v26  ;;  %v986_v36 = vrot.slane %v985_v27, 2  ;;  %v871_v38 = vmax.f32 %v869_v24, %v870_v30  ;;  %v979_v39 = vrot.slane %v978_v31, 2 }
  0xeb   : > { %v817_v40 = vrot.slane %v816_v32, 4  ;;  %v810_v49 = vrot.slane %v809_v41, 4  ;;  %v912_v60 = vsel %vm865_vm9, %v739_v28, -inf  ;;  %v793_v7 = vrot.slane %v2003_v50, 1 }
  0xec   : > { %v881_v43 = vrot.slane %v880_v35, 2  ;;  %v987_v44 = vmax.f32 %v985_v27, %v986_v36  ;;  %v723_v45 = vpop.xlane.xlu1 %722  ;;  %v720_v46 = vpop.xlane.xlu0 %719  ;;  %v980_v47 = vmax.f32 %v978_v31, %v979_v39  ;;  %v872_v55 = vrot.slane %v871_v38, 2 }
  0xed   : > { %v818_v48 = vmax.f32 %v816_v32, %v817_v40  ;;  %v811_v57 = vmax.f32 %v809_v41, %v810_v49  ;;  %v990_v61 = vsel %vm975_vm11, %v723_v45, -inf  ;;  %v886_v6 = vsel %vm867_vm10, %v723_v45, -inf  ;;  %v1142_v40 = vld [vmem:[#allocation7] sm:$0xe0] }
  0xee   : > { %v988_v51 = vrot.slane %v987_v44, 1  ;;  %v981_v56 = vrot.slane %v980_v47, 1  ;;  %v882_v58 = vmax.f32 %v880_v35, %v881_v43  ;;  %v991_v8 = vrot.slane %v990_v61, 4 }
  0xef   : > { %v819_v4 = vrot.slane %v818_v48, 2  ;;  %v812_v5 = vrot.slane %v811_v57, 2  ;;  %v795_v9 = vsel %vm780_vm8, %v720_v46, -inf  ;;  %v885_v10 = vsel %vm865_vm9, %v720_v46, -inf }
  0xf0   : > { %v989_v59 = vmax.f32 %v987_v44, %v988_v51  ;;  %v742_v62 = vpop.xlane.xlu1 %741  ;;  %v736_v2 = vpop.xlane.xlu0 %735  ;;  %v982_v3 = vmax.f32 %v980_v47, %v981_v56  ;;  %v786_v11 = vrot.slane %v785_v54, 1  ;;  %v873_v12 = vmax.f32 %v871_v38, %v872_v55 }
  0xf1   : > { %v903_v14 = vsel %vm865_vm9, %v733_v29, -inf  ;;  %v992_v15 = vmax.f32 %v990_v61, %v991_v8  ;;  %v796_v16 = vrot.slane %v795_v9, 4  ;;  %v887_v17 = vmax.f32 %v885_v10, %v886_v6 }
  0xf2   : > { %v2014_v13 = vsel %vm331_vm12, %v989_v59, %v982_v3  ;;  %v913_v18 = vsel %vm867_vm10, %v742_v62, -inf  ;;  %v883_v21 = vrot.slane %v882_v58, 1  ;;  %v820_v22 = vmax.f32 %v818_v48, %v819_v4 }
  0xf3   : > { %v813_v23 = vmax.f32 %v811_v57, %v812_v5  ;;  %v914_v24 = vmax.f32 %v912_v60, %v913_v18  ;;  %v993_v25 = vrot.slane %v992_v15, 2  ;;  %v797_v26 = vmax.f32 %v795_v9, %v796_v16 }
  0xf4   : > { %v2018_v19 = vpop.xlane.xlu1 %757  ;;  %v2020_v20 = vpop.xlane.xlu0 %744  ;;  %v888_v27 = vrot.slane %v887_v17, 4  ;;  %v1011_v28 = vsel %vm975_vm11, %v742_v62, -inf  ;;  %v874_v30 = vrot.slane %v873_v12, 1  ;;  %v904_v32 = vsel %vm867_vm10, %v736_v2, -inf }
  0xf5   : > { %v915_v29 = vrot.slane %v914_v24, 4  ;;  %v1012_v31 = vrot.slane %v1011_v28, 4  ;;  %v994_v33 = vmax.f32 %v992_v15, %v993_v25  ;;  %v798_v34 = vrot.slane %v797_v26, 2 }
  0xf6   : > { %v889_v35 = vmax.f32 %v887_v17, %v888_v27  ;;  %v905_v36 = vmax.f32 %v903_v14, %v904_v32  ;;  %v821_v41 = vrot.slane %v820_v22, 1  ;;  %v1004_v45 = vsel %vm975_vm11, %v736_v2, -inf }
  0xf7   : > { %v916_v43 = vmax.f32 %v914_v24, %v915_v29  ;;  %v1013_v44 = vmax.f32 %v1011_v28, %v1012_v31  ;;  %v814_v46 = vrot.slane %v813_v23, 1  ;;  %v995_v47 = vrot.slane %v994_v33, 1 }
  0xf8   : > { %v2024_v38 = vpop.xlane.xlu1 %725  ;;  %v2026_v39 = vpop.xlane.xlu0 %763  ;;  %v890_v48 = vrot.slane %v889_v35, 2  ;;  %v906_v49 = vrot.slane %v905_v36, 4  ;;  %v799_v51 = vmax.f32 %v797_v26, %v798_v34  ;;  %v1005_v56 = vrot.slane %v1004_v45, 4 }
  0xf9   : > { %v917_v55 = vrot.slane %v916_v43, 2  ;;  %v1150_v57 = vrot.slane %v1142_v40, 5  ;;  %v794_v59 = vmax.f32 %v2003_v50, %v793_v7  ;;  %v787_v60 = vmax.f32 %v785_v54, %v786_v11 }
  0xfa   : > { %v1014_v61 = vrot.slane %v1013_v44, 2  ;;  %v837_v62 = vsel %vm780_vm8, %v2018_v19, -inf  ;;  %v884_v5 = vmax.f32 %v882_v58, %v883_v21  ;;  %v875_v6 = vmax.f32 %v873_v12, %v874_v30 }
  0xfb   : > { %v891_v2 = vmax.f32 %v889_v35, %v890_v48  ;;  %v907_v8 = vmax.f32 %v905_v36, %v906_v49  ;;  %v822_v9 = vmax.f32 %v820_v22, %v821_v41  ;;  %v815_v10 = vmax.f32 %v813_v23, %v814_v46 }
  0xfc   : > { %v748_v3 = vpop.xlane.xlu1 %747  ;;  %v729_v4 = vpop.xlane.xlu0 %728  ;;  %v996_v14 = vmax.f32 %v994_v33, %v995_v47  ;;  %v1006_v15 = vmax.f32 %v1004_v45, %v1005_v56  ;;  %v800_v16 = vrot.slane %v799_v51, 1  ;;  %v918_v17 = vmax.f32 %v916_v43, %v917_v55 }
  0xfd   : > { %v838_v18 = vrot.slane %v837_v62, 4  ;;  %v2032_v50 = vmax.f32 %v1013_v44, %v1014_v61  ;;  %v823_v54 = vsel %vm780_vm8, %v2020_v20, -inf  ;;  %v2045_v58 = vsel %vm867_vm10, %v1153_v53, %v1154_v0 }
  0xfe   : > { %v2050_v12 = vsel %vm867_vm10, %v1150_v57, %v1151_v52  ;;  %v2053_v21 = vsel %vm331_vm12, %v794_v59, %v787_v60  ;;  %v2056_v22 = vsel %vm331_vm12, %v884_v5, %v875_v6  ;;  %v892_v23 = vrot.slane %v891_v2, 1 }
  0xff   : > { %v908_v24 = vrot.slane %v907_v8, 2  ;;  %v2059_v63 = vsel %vm331_vm12, %v822_v9, %v815_v10  ;;  %v2063_v0 = vsel %vm333_vm13, %v996_v14, %v2014_v13  ;;  %v1007_v42 = vrot.slane %v1006_v15, 2 }
 0x100   : > { %v2036_v7 = vpop.xlane.xlu1 %760  ;;  %v2038_v11 = vpop.xlane.xlu0 %750  ;;  %v824_v53 = vrot.slane %v823_v54, 4  ;;  %v2065_v25 = vmax.f32 %v799_v51, %v800_v16  ;;  %v919_v26 = vrot.slane %v918_v17, 1  ;;  %v839_v27 = vmax.f32 %v837_v62, %v838_v18 }
 0x101   : > { %v802_v28 = vsel %vm780_vm8, %v2024_v38, -inf  ;;  %v1016_v30 = vrot.slane %v2032_v50, 1  ;;  %v844_v32 = vsel %vm780_vm8, %v2026_v39, -inf  ;;  %v2076_v34 = vmax.f32 %v891_v2, %v892_v23 }
 0x102   : > { %v825_v29 = vmax.f32 %v823_v54, %v824_v53  ;;  %v803_v31 = vrot.slane %v802_v28, 4  ;;  %v909_v35 = vmax.f32 %v907_v8, %v908_v24  ;;  %v939_v36 = vsel %vm865_vm9, %v2018_v19, -inf }
 0x103   : > { %v845_v40 = vrot.slane %v844_v32, 4  ;;  %v1008_v41 = vmax.f32 %v1006_v15, %v1007_v42  ;;  %v921_v43 = vsel %vm865_vm9, %v2020_v20, -inf  ;;  %v922_v45 = vsel %vm867_vm10, %v748_v3, -inf }
 0x104   : > { %v2072_v33 = vpop.xlane.xlu1 %769  ;;  %v2074_v13 = vpop.xlane.xlu0 %766  ;;  %v804_v44 = vmax.f32 %v802_v28, %v803_v31  ;;  %v840_v46 = vrot.slane %v839_v27, 2  ;;  %v894_v47 = vsel %vm865_vm9, %v2024_v38, -inf  ;;  %v923_v49 = vmax.f32 %v921_v43, %v922_v45 }
 0x105   : > { %v846_v48 = vmax.f32 %v844_v32, %v845_v40  ;;  %v826_v51 = vrot.slane %v825_v29, 2  ;;  %v1018_v56 = vsel %vm975_vm11, %v748_v3, -inf  ;;  %v895_v19 = vsel %vm867_vm10, %v729_v4, -inf }
 0x106   : > { %v805_v55 = vrot.slane %v804_v44, 2  ;;  %v924_v60 = vrot.slane %v923_v49, 4  ;;  %v1019_v61 = vrot.slane %v1018_v56, 4  ;;  %v896_v62 = vmax.f32 %v894_v47, %v895_v19 }
 0x107   : > { %v847_v20 = vrot.slane %v846_v48, 2  ;;  %v920_v5 = vmax.f32 %v918_v17, %v919_v26  ;;  %v910_v6 = vrot.slane %v909_v35, 1  ;;  %v997_v38 = vsel %vm975_vm11, %v729_v4, -inf }
 0x108   : > { %v2087_v57 = vpop.xlane.xlu1 %278  ;;  %v2089_v59 = vpop.xlane.xlu0 %275  ;;  %v940_v2 = vsel %vm867_vm10, %v2036_v7, -inf  ;;  %v1009_v8 = vrot.slane %v1008_v41, 1  ;;  %v925_v9 = vmax.f32 %v923_v49, %v924_v60  ;;  %v1020_v3 = vmax.f32 %v1018_v56, %v1019_v61 }
 0x109   : > { %v897_v10 = vrot.slane %v896_v62, 4  ;;  %v841_v14 = vmax.f32 %v839_v27, %v840_v46  ;;  %v827_v15 = vmax.f32 %v825_v29, %v826_v51  ;;  %v998_v16 = vrot.slane %v997_v38, 4 }
 0x10a   : > { %v941_v18 = vmax.f32 %v939_v36, %v940_v2  ;;  %v806_v24 = vmax.f32 %v804_v44, %v805_v55  ;;  %v848_v42 = vmax.f32 %v846_v48, %v847_v20  ;;  %v926_v53 = vrot.slane %v925_v9, 2 }
 0x10b   : > { %v1021_v17 = vrot.slane %v1020_v3, 2  ;;  %v898_v26 = vmax.f32 %v896_v62, %v897_v10  ;;  %v999_v28 = vmax.f32 %v997_v38, %v998_v16  ;;  %v1032_v31 = vsel %vm975_vm11, %v2036_v7, -inf }
 0x10c   : > { %v285_v54 = vpop.xlane.xlu1 %284  ;;  %v282_v23 = vpop.xlane.xlu0 %281  ;;  %v942_v4 = vrot.slane %v941_v18, 4  ;;  %v1017_v32 = vmax.f32 %v2032_v50, %v1016_v30  ;;  %v911_v40 = vmax.f32 %v909_v35, %v910_v6  ;;  %v927_v43 = vmax.f32 %v925_v9, %v926_v53 }
 0x10d   : > { %v1022_v27 = vmax.f32 %v1020_v3, %v1021_v17  ;;  %v1000_v29 = vrot.slane %v999_v28, 2  ;;  %v1033_v36 = vrot.slane %v1032_v31, 4  ;;  %v830_v44 = vsel %vm780_vm8, %v2038_v11, -inf }
 0x10e   : > { %v943_v45 = vmax.f32 %v941_v18, %v942_v4  ;;  %v1010_v48 = vmax.f32 %v1008_v41, %v1009_v8  ;;  %v842_v49 = vrot.slane %v841_v14, 1  ;;  %v828_v51 = vrot.slane %v827_v15, 1 }
 0x10f   : > { %v807_v55 = vrot.slane %v806_v24, 1  ;;  %v849_v56 = vrot.slane %v848_v42, 1  ;;  %v899_v7 = vrot.slane %v898_v26, 2  ;;  %v1034_v19 = vmax.f32 %v1032_v31, %v1033_v36 }
 0x110   : > { %v773_v46 = vpop.xlane.xlu1 %772  ;;  %v2099_v47 = vpop.xlane.xlu0 %753  ;;  %v831_v50 = vrot.slane %v830_v44, 4  ;;  %v2104_v30 = vsel %vm333_vm13, %v2076_v34, %v2056_v22  ;;  %v2107_v35 = vsel %vm331_vm12, %v920_v5, %v911_v40  ;;  %v948_v20 = vsel %vm865_vm9, %v2026_v39, -inf }
 0x111   : > { %v928_v60 = vrot.slane %v927_v43, 1  ;;  %v1023_v41 = vrot.slane %v1022_v27, 1  ;;  %v1001_v61 = vmax.f32 %v999_v28, %v1000_v29  ;;  %v944_v62 = vrot.slane %v943_v45, 2 }
 0x112   : > { %v832_v6 = vmax.f32 %v830_v44, %v831_v50  ;;  %v2116_v8 = vsel %vm331_vm12, %v1017_v32, %v1010_v48  ;;  %v843_v22 = vmax.f32 %v841_v14, %v842_v49  ;;  %v2118_v34 = vmax.f32 %v827_v15, %v828_v51 }
 0x113   : > { %v851_v5 = vsel %vm780_vm8, %v2072_v33, -inf  ;;  %v2122_v9 = vmax.f32 %v806_v24, %v807_v55  ;;  %v850_v39 = vmax.f32 %v848_v42, %v849_v56  ;;  %v900_v3 = vmax.f32 %v898_v26, %v899_v7 }
 0x114   : > { %v2111_v38 = vpop.xlane.xlu1 %287  ;;  %v2113_v2 = vpop.xlane.xlu0 %775  ;;  %v1035_v10 = vrot.slane %v1034_v19, 2  ;;  %v929_v16 = vmax.f32 %v927_v43, %v928_v60  ;;  %v852_v18 = vrot.slane %v851_v5, 4  ;;  %v949_v53 = vsel %vm867_vm10, %v2074_v13, -inf }
 0x115   : > { %v1039_v17 = vsel %vm975_vm11, %v2074_v13, -inf  ;;  %v1024_v28 = vmax.f32 %v1022_v27, %v1023_v41  ;;  %v1002_v14 = vrot.slane %v1001_v61, 1  ;;  %v945_v15 = vmax.f32 %v943_v45, %v944_v62 }
 0x116   : > { %v833_v4 = vrot.slane %v832_v6, 2  ;;  %v853_v24 = vmax.f32 %v851_v5, %v852_v18  ;;  %v950_v42 = vmax.f32 %v948_v20, %v949_v53  ;;  %v1040_v26 = vrot.slane %v1039_v17, 4 }
 0x117   : > { %v298_v40 = vmax.f32 %v2089_v59, %v2087_v57  ;;  %v1036_v43 = vmax.f32 %v1034_v19, %v1035_v10  ;;  %v957_v29 = vsel %vm865_vm9, %v2072_v33, -inf  ;;  %v305_v36 = vmax.f32 %v282_v23, %v285_v54 }
 0x118   : > { %v2128_v31 = vpop.xlane.xlu1 %778  ;;  %v2130_v32 = vpop.xlane.xlu0 %290  ;;  %v958_v13 = vsel %vm867_vm10, %v773_v46, -inf  ;;  %v854_v27 = vrot.slane %v853_v24, 2  ;;  %v951_v45 = vrot.slane %v950_v42, 4  ;;  %v1041_v44 = vmax.f32 %v1039_v17, %v1040_v26 }
 0x119   : > { %v299_v48 = vrot.slane %v298_v40, 4  ;;  %v834_v49 = vmax.f32 %v832_v6, %v833_v4  ;;  %v306_v51 = vrot.slane %v305_v36, 4  ;;  %v959_v55 = vmax.f32 %v957_v29, %v958_v13 }
 0x11a   : > { %v1046_v56 = vsel %vm975_vm11, %v773_v46, -inf  ;;  %v855_v59 = vmax.f32 %v853_v24, %v854_v27  ;;  %v952_v19 = vmax.f32 %v950_v42, %v951_v45  ;;  %v1042_v33 = vrot.slane %v1041_v44, 2 }
 0x11b   : > { %v300_v54 = vmax.f32 %v298_v40, %v299_v48  ;;  %v307_v23 = vmax.f32 %v305_v36, %v306_v51  ;;  %v960_v50 = vrot.slane %v959_v55, 4  ;;  %v1047_v20 = vrot.slane %v1046_v56, 4 }
 0x11c   : > { %v2138_v7 = vpop.xlane.xlu1 %296  ;;  %v2140_v57 = vpop.xlane.xlu0 %293  ;;  %v931_v60 = vsel %vm867_vm10, %v2099_v47, -inf  ;;  %v901_v41 = vrot.slane %v900_v3, 1  ;;  %v930_v62 = vsel %vm865_vm9, %v2038_v11, -inf  ;;  %v856_v6 = vrot.slane %v855_v59, 1 }
 0x11d   : > { %v953_v46 = vrot.slane %v952_v19, 2  ;;  %v1043_v5 = vmax.f32 %v1041_v44, %v1042_v33  ;;  %v301_v10 = vrot.slane %v300_v54, 2  ;;  %v308_v18 = vrot.slane %v307_v23, 2 }
 0x11e   : > { %v932_v53 = vmax.f32 %v930_v62, %v931_v60  ;;  %v1080_v24 = vsel %vm331_vm12, %v850_v39, %v843_v22  ;;  %v1003_v42 = vmax.f32 %v1001_v61, %v1002_v14  ;;  %v946_v26 = vrot.slane %v945_v15, 1 }
 0x11f   : > { %v1037_v40 = vrot.slane %v1036_v43, 1  ;;  %v835_v29 = vrot.slane %v834_v49, 1  ;;  %v961_v36 = vmax.f32 %v959_v55, %v960_v50  ;;  %v1048_v13 = vmax.f32 %v1046_v56, %v1047_v20 }
 0x120   : > { %v439_v17 = vpop.xlane.xlu1 %438  ;;  %v2146_v4 = vpop.xlane.xlu0 %432  ;;  %v933_v27 = vrot.slane %v932_v53, 4  ;;  %v2151_v11 = vsel %vm333_vm13, %v929_v16, %v2107_v35  ;;  %v2155_v45 = vsel %vm333_vm13, %v1024_v28, %v2116_v8  ;;  %v857_v44 = vmax.f32 %v855_v59, %v856_v6 }
 0x121   : > { %v954_v48 = vmax.f32 %v952_v19, %v953_v46  ;;  %v2157_v51 = vmax.f32 %v900_v3, %v901_v41  ;;  %v1044_v22 = vrot.slane %v1043_v5, 1  ;;  %v302_v61 = vmax.f32 %v300_v54, %v301_v10 }
 0x122   : > { %v309_v39 = vmax.f32 %v307_v23, %v308_v18  ;;  %v2163_v55 = vsel %vm335_vm14, %v1003_v42, %v2063_v0  ;;  %v947_v56 = vmax.f32 %v945_v15, %v946_v26  ;;  %v1038_v35 = vmax.f32 %v1036_v43, %v1037_v40 }
 0x123   : > { %v1025_v16 = vsel %vm975_vm11, %v2099_v47, -inf  ;;  %v2167_v8 = vmax.f32 %v834_v49, %v835_v29  ;;  %v962_v28 = vrot.slane %v961_v36, 2  ;;  %v1049_v59 = vrot.slane %v1048_v13, 2 }
 0x124   : > { %v2159_v14 = vpop.xlane.xlu1 %463  ;;  %v934_v3 = vmax.f32 %v932_v53, %v933_v27  ;;  %v2169_v19 = vpop.xlane.xlu0 %457  ;;  %v2172_v33 = vsel %vm333_vm13, %v857_v44, %v1080_v24  ;;  %v955_v54 = vrot.slane %v954_v48, 1  ;;  %v1026_v23 = vrot.slane %v1025_v16, 4 }
 0x125   : > { %v858_v0 = vsel %vm780_vm8, %v2113_v2, -inf  ;;  %v1045_v15 = vmax.f32 %v1043_v5, %v1044_v22  ;;  %v303_v43 = vrot.slane %v302_v61, 1  ;;  %v310_v50 = vrot.slane %v309_v39, 1 }
 0x126   : > { %v859_v20 = vrot.slane %v858_v0, 4  ;;  %v966_v49 = vsel %vm865_vm9, %v2113_v2, -inf  ;;  %v967_v60 = vsel %vm867_vm10, %v2128_v31, -inf  ;;  %v1053_v41 = vsel %vm975_vm11, %v2128_v31, -inf }
 0x127   : > { %v312_v62 = vmax.f32 %v2111_v38, %v2130_v32  ;;  %v963_v6 = vmax.f32 %v961_v36, %v962_v28  ;;  %v935_v46 = vrot.slane %v934_v3, 2  ;;  %v968_v10 = vmax.f32 %v966_v49, %v967_v60 }
 0x128   : > { %v2176_v47 = vpop.xlane.xlu1 %441  ;;  %v860_v5 = vmax.f32 %v858_v0, %v859_v20  ;;  %v1027_v18 = vmax.f32 %v1025_v16, %v1026_v23  ;;  %v1054_v53 = vrot.slane %v1053_v41, 4  ;;  %v319_v42 = vmax.f32 %v2140_v57, %v2138_v7  ;;  %v2190_v27 = vpop.xlane.xlu0 %435 }
 0x129   : > { %v313_v24 = vrot.slane %v312_v62, 4  ;;  %v956_v2 = vmax.f32 %v954_v48, %v955_v54  ;;  %v2188_v26 = vmax.f32 %v1048_v13, %v1049_v59  ;;  %v969_v40 = vrot.slane %v968_v10, 4 }
 0x12a   : > { %v486_v29 = vrot.slane %v439_v17, 4  ;;  %v2193_v31 = vsel %vm331_vm12, %v1045_v15, %v1038_v35  ;;  %v1055_v38 = vmax.f32 %v1053_v41, %v1054_v53  ;;  %v320_v36 = vrot.slane %v319_v42, 4 }
 0x12b   : > { %v314_v32 = vmax.f32 %v312_v62, %v313_v24  ;;  %v936_v44 = vmax.f32 %v934_v3, %v935_v46  ;;  %v861_v22 = vrot.slane %v860_v5, 2  ;;  %v970_v16 = vmax.f32 %v968_v10, %v969_v40 }
 0x12c   : > { %v487_v28 = vmax.f32 %v439_v17, %v486_v29  ;;  %v2195_v23 = vpop.xlane.xlu1 %469  ;;  %v304_v7 = vmax.f32 %v302_v61, %v303_v43  ;;  %v1028_v57 = vrot.slane %v1027_v18, 2  ;;  %v321_v48 = vmax.f32 %v319_v42, %v320_v36  ;;  %v2200_v46 = vpop.xlane.xlu0 %444 }
 0x12d   : > { %v315_v13 = vrot.slane %v314_v32, 2  ;;  %v311_v59 = vmax.f32 %v309_v39, %v310_v50  ;;  %v971_v54 = vrot.slane %v970_v16, 2  ;;  %v1056_v0 = vrot.slane %v1055_v38, 2 }
 0x12e   : > { %v480_v20 = vrot.slane %v2146_v4, 4  ;;  %v964_v35 = vrot.slane %v963_v6, 1  ;;  %v322_v49 = vrot.slane %v321_v48, 2  ;;  %v488_v60 = vrot.slane %v487_v28, 2 }
 0x12f   : > { %v316_v15 = vmax.f32 %v314_v32, %v315_v13  ;;  %v1104_v3 = vsel %vm331_vm12, %v956_v2, %v947_v56  ;;  %v1051_v41 = vrot.slane %v2188_v26, 1  ;;  %v937_v17 = vrot.slane %v936_v44, 1 }
 0x130   : > { %v862_v62 = vmax.f32 %v860_v5, %v861_v22  ;;  %v1029_v61 = vmax.f32 %v1027_v18, %v1028_v57  ;;  %v323_v10 = vmax.f32 %v321_v48, %v322_v49  ;;  %v510_v39 = vrot.slane %v2159_v14, 4  ;;  %v2205_v40 = vpop.xlane.xlu1 %450 }
 0x131   : > { %v317_v43 = vrot.slane %v316_v15, 1  ;;  %v972_v50 = vmax.f32 %v970_v16, %v971_v54  ;;  %v1057_v53 = vmax.f32 %v1055_v38, %v1056_v0  ;;  %v481_v24 = vmax.f32 %v2146_v4, %v480_v20 }
 0x132   : > { %v504_v42 = vrot.slane %v2169_v19, 4  ;;  %v965_v56 = vmax.f32 %v963_v6, %v964_v35  ;;  %v324_v2 = vrot.slane %v323_v10, 1  ;;  %v489_v29 = vmax.f32 %v487_v28, %v488_v60  ;;  %v2211_v28 = vpop.xlane.xlu0 %447 }
 0x133   : > { %v511_v5 = vmax.f32 %v2159_v14, %v510_v39  ;;  %v938_v32 = vmax.f32 %v936_v44, %v937_v17  ;;  %v863_v18 = vrot.slane %v862_v62, 1  ;;  %v318_v36 = vmax.f32 %v316_v15, %v317_v43 }
 0x134   : > { %v505_v22 = vmax.f32 %v2169_v19, %v504_v42  ;;  %v325_v57 = vmax.f32 %v323_v10, %v324_v2  ;;  %v534_v38 = vrot.slane %v2176_v47, 4  ;;  %v528_v4 = vrot.slane %v2190_v27, 4  ;;  %v2217_v60 = vpop.xlane.xlu1 %466 }
 0x135   : > { %v512_v16 = vrot.slane %v511_v5, 2  ;;  %v1030_v13 = vrot.slane %v1029_v61, 1  ;;  %v973_v48 = vrot.slane %v972_v50, 1  ;;  %v1058_v6 = vrot.slane %v1057_v53, 1 }
 0x136   : > { %v482_v54 = vrot.slane %v481_v24, 2  ;;  %v490_v14 = vrot.slane %v489_v29, 1  ;;  %v506_v44 = vrot.slane %v505_v22, 2  ;;  %v516_v0 = vrot.slane %v2195_v23, 4 }
 0x137   : > { %v332_v19 = vsel %vm331_vm12, %v311_v59, %v304_v7  ;;  %v1052_v20 = vmax.f32 %v2188_v26, %v1051_v41  ;;  %v864_v35 = vmax.f32 %v862_v62, %v863_v18  ;;  %v513_v15 = vmax.f32 %v511_v5, %v512_v16 }
 0x138   : > { %v334_v49 = vsel %vm333_vm13, %v318_v36, %v332_v19  ;;  %v1105_v17 = vsel %vm333_vm13, %v965_v56, %v1104_v3  ;;  %v535_v43 = vmax.f32 %v2176_v47, %v534_v38  ;;  %v529_v10 = vmax.f32 %v2190_v27, %v528_v4 }
 0x139   : > { %v336_v39 = vsel %vm335_vm14, %v325_v57, %v334_v49  ;;  %v1031_v42 = vmax.f32 %v1029_v61, %v1030_v13  ;;  %v1098_v26 = vsel %vm335_vm14, %v938_v32, %v2151_v11  ;;  %v974_v7 = vmax.f32 %v972_v50, %v973_v48 }
 0x13a   : > { %v2225_v59 = vmax.f32 %v481_v24, %v482_v54  ;;  %1402 = vmatmul.mubr.msk.f32.vlgmr.msra.gmra.mxu0 %vm346_vm15, %v336_v39  ;;  %v1059_v41 = vmax.f32 %v1057_v53, %v1058_v6  ;;  %v2228_v62 = vmax.f32 %v489_v29, %v490_v14  ;;  %v507_v3 = vmax.f32 %v505_v22, %v506_v44 }
 0x13b   : > { %v517_v47 = vmax.f32 %v2195_v23, %v516_v0  ;;  %1408 = vmatpush1.msk.msra.mxu0 %vm349_vm6, %v1151_v52  ;;  %vm1158_vm8 = vcmask 72704   ;;  %v514_v27 = vrot.slane %v513_v15, 1  ;;  %v1065_v11 = vsel %vm333_vm13, %v2065_v25, %v2053_v21  ;;  %v461_v23 = vpop.xlane.xlu0 %460  ;;  %1230 = vmatprep.mubr.f32.mxu0 %v1684_v1 }
 0x13c   : > { %v1073_v61 = vsel %vm333_vm13, %v2118_v34, %v2059_v63  ;;  %v1082_v50 = vsel %vm335_vm14, %v864_v35, %v2172_v33  ;;  %1196 = vmatprep.subr.mxu0 %v2045_v58  ;;  %v536_v53 = vrot.slane %v535_v43, 2  ;;  %v530_v37 = vrot.slane %v529_v10, 2  ;;  %v454_v34 = vpop.xlane.xlu1 %453 }
 0x13d   : > { %v1066_v52 = vsel %vm335_vm14, %v2122_v9, %v1065_v11  ;;  %v1074_v24 = vsel %vm335_vm14, %v2167_v8, %v1073_v61  ;;  %1197 = vmatpush1.msra.mxu0 %v2050_v12  ;;  %v1106_v21 = vsel %vm335_vm14, %v974_v7, %v1105_v17  ;;  %v484_v63 = vrot.slane %v2225_v59, 1 }
 0x13e   : > { %v1132_v25 = vsel %vm346_vm15, %v1066_v52, %v1074_v24  ;;  %v492_v58 = vrot.slane %v2200_v46, 4  ;;  %v508_v33 = vrot.slane %v507_v3, 1  ;;  %v1090_v9 = vsel %vm335_vm14, %v2157_v51, %v2104_v30 }
 0x13f   : > { %v1133_v8 = vsel %vm609_vm1, %v1132_v25, %v1082_v50  ;;  %v498_v12 = vrot.slane %v2205_v40, 4  ;;  %v515_v56 = vmax.f32 %v513_v15, %v514_v27  ;;  %v518_v1 = vrot.slane %v517_v47, 2  ;;  %v476_v16 = vpop.xlane.xlu0 %475 }
 0x140   : > { %v1134_v2 = vsel %vm611_vm2, %v1133_v8, %v1090_v9  ;;  %v493_v29 = vmax.f32 %v2200_v46, %v492_v58  ;;  %v537_v5 = vmax.f32 %v535_v43, %v536_v53  ;;  %v531_v32 = vmax.f32 %v529_v10, %v530_v37  ;;  %v479_v54 = vpop.xlane.xlu1 %478 }
 0x141   : > { %v1135_v18 = vsel %vm619_vm3, %v1134_v2, %v1098_v26  ;;  %v499_v36 = vmax.f32 %v2205_v40, %v498_v12  ;;  %v1122_v30 = vsel %vm335_vm14, %v1031_v42, %v2155_v45  ;;  %v1129_v51 = vsel %vm333_vm13, %v1052_v20, %v2193_v31 }
 0x142   : > { %v494_v22 = vrot.slane %v493_v29, 2  ;;  %v1136_v57 = vsel %vm705_vm0, %v1135_v18, %v1106_v21  ;;  %v1130_v38 = vsel %vm335_vm14, %v1059_v41, %v1129_v51  ;;  %v540_v4 = vrot.slane %v2211_v28, 4 }
 0x143   : > { %v1138_v46 = vsel %vm1137_vm5, %v1136_v57, %v2163_v55  ;;  %v558_v13 = vrot.slane %v2217_v60, 4  ;;  %v500_v40 = vrot.slane %v499_v36, 2  ;;  %v552_v6 = vrot.slane %v461_v23, 4  ;;  %v473_v7 = vpop.xlane.xlu0 %472 }
 0x144   : > { %v1140_v48 = vsel %vm1139_vm7, %v1138_v46, %v1122_v30  ;;  %v546_v45 = vrot.slane %v454_v34, 4  ;;  %v519_v14 = vmax.f32 %v517_v47, %v518_v1  ;;  %v541_v44 = vmax.f32 %v2211_v28, %v540_v4 }
 0x145   : > { %v1141_v31 = vsel %vm430_vm4, %v1140_v48, %v1130_v38  ;;  %v559_v0 = vmax.f32 %v2217_v60, %v558_v13  ;;  %v509_v19 = vmax.f32 %v507_v3, %v508_v33  ;;  %v553_v55 = vmax.f32 %v461_v23, %v552_v6 }
 0x146   : > { %1409 = vmatmul.mubr.msk.f32.vlgmr.msra.gmra.mxu0 %vm1158_vm8, %v1141_v31  ;;  %v547_v20 = vmax.f32 %v454_v34, %v546_v45  ;;  %v522_v35 = vrot.slane %v476_v16, 4  ;;  %v495_v15 = vmax.f32 %v493_v29, %v494_v22  ;;  %v542_v49 = vrot.slane %v541_v44, 2 }
 0x147   : > { %v560_v17 = vrot.slane %v559_v0, 2  ;;  %v570_v43 = vrot.slane %v479_v54, 4  ;;  %v501_v10 = vmax.f32 %v499_v36, %v500_v40  ;;  %v554_v39 = vrot.slane %v553_v55, 2 }
 0x148   : > { %v548_v42 = vrot.slane %v547_v20, 2  ;;  %v523_v26 = vmax.f32 %v476_v16, %v522_v35  ;;  %v538_v41 = vrot.slane %v537_v5, 1  ;;  %v520_v47 = vrot.slane %v519_v14, 1 }
 0x149   : > { %v543_v28 = vmax.f32 %v541_v44, %v542_v49  ;;  %v571_v27 = vmax.f32 %v479_v54, %v570_v43  ;;  %v561_v60 = vmax.f32 %v559_v0, %v560_v17  ;;  %v555_v3 = vmax.f32 %v553_v55, %v554_v39 }
 0x14a   : > { %v549_v11 = vmax.f32 %v547_v20, %v548_v42  ;;  %v524_v61 = vrot.slane %v523_v26, 2  ;;  %v532_v50 = vrot.slane %v531_v32, 1  ;;  %v496_v23 = vrot.slane %v495_v15, 1  ;;  %v1243_v20 = vld [vmem:[%s1849_s28] sm:$0xff] }
 0x14b   : > { %v572_v53 = vrot.slane %v571_v27, 2  ;;  %v564_v37 = vrot.slane %v473_v7, 4  ;;  %v485_v52 = vmax.f32 %v2225_v59, %v484_v63  ;;  %v502_v24 = vrot.slane %v501_v10, 1  ;;  %1411 = vst [vmem:[%s263_s20 + $0x18] sm:$0xff] %v1243_v20 }
 0x14c   : > { %v544_v21 = vrot.slane %v543_v28, 1  ;;  %v525_v25 = vmax.f32 %v523_v26, %v524_v61  ;;  %v521_v58 = vmax.f32 %v519_v14, %v520_v47  ;;  %v550_v34 = vrot.slane %v549_v11, 1 }
 0x14d   : > { %v573_v33 = vmax.f32 %v571_v27, %v572_v53  ;;  %v565_v9 = vmax.f32 %v473_v7, %v564_v37  ;;  %v588_v8 = vsel %vm331_vm12, %v515_v56, %v509_v19  ;;  %v562_v12 = vrot.slane %v561_v60, 1 }
 0x14e   : > { %v556_v1 = vrot.slane %v555_v3, 1  ;;  %v526_v2 = vrot.slane %v525_v25, 1  ;;  %v539_v29 = vmax.f32 %v537_v5, %v538_v41  ;;  %v533_v18 = vmax.f32 %v531_v32, %v532_v50 }
 0x14f   : > { %v497_v36 = vmax.f32 %v495_v15, %v496_v23  ;;  %v566_v22 = vrot.slane %v565_v9, 2  ;;  %v503_v30 = vmax.f32 %v501_v10, %v502_v24  ;;  %v545_v51 = vmax.f32 %v543_v28, %v544_v21 }
 0x150   : > { %v527_v57 = vmax.f32 %v525_v25, %v526_v2  ;;  %v574_v59 = vrot.slane %v573_v33, 1  ;;  %v589_v63 = vsel %vm333_vm13, %v521_v58, %v588_v8  ;;  %v551_v16 = vmax.f32 %v549_v11, %v550_v34 }
 0x151   : > { %v567_v38 = vmax.f32 %v565_v9, %v566_v22  ;;  %v580_v46 = vsel %vm331_vm12, %v2228_v62, %v485_v52  ;;  %v563_v4 = vmax.f32 %v561_v60, %v562_v12  ;;  %v557_v56 = vmax.f32 %v555_v3, %v556_v1 }
 0x152   : > { %v590_v13 = vsel %vm335_vm14, %v527_v57, %v589_v63  ;;  %v596_v5 = vsel %vm331_vm12, %v539_v29, %v533_v18  ;;  %v581_v32 = vsel %vm333_vm13, %v497_v36, %v580_v46  ;;  %v575_v48 = vmax.f32 %v573_v33, %v574_v59 }
 0x153   : > { %v568_v40 = vrot.slane %v567_v38, 1  ;;  %v582_v6 = vsel %vm335_vm14, %v503_v30, %v581_v32  ;;  %v597_v45 = vsel %vm333_vm13, %v545_v51, %v596_v5  ;;  %v604_v31 = vsel %vm331_vm12, %v563_v4, %v557_v56 }
 0x154   : > { %v598_v14 = vsel %vm335_vm14, %v551_v16, %v597_v45  ;;  %v608_v62 = vsel %vm346_vm15, %v582_v6, %v590_v13 }
 0x155   : > { %v569_v54 = vmax.f32 %v567_v38, %v568_v40  ;;  %v610_v19 = vsel %vm609_vm1, %v608_v62, %v598_v14 }
 0x157   : > { %v605_v44 = vsel %vm333_vm13, %v569_v54, %v604_v31 }
 0x158   : > { %v606_v0 = vsel %vm335_vm14, %v575_v48, %v605_v44 }
 0x159   : > { %v612_v55 = vsel %vm611_vm2, %v610_v19, %v606_v0 }
 0x15a   : > { %1405 = vmatmul.mubr.msk.f32.vlgmr.msra.gmra.mxu1 %vm619_vm3, %v612_v55 }
 0x1fa   : > { %v420_v35 = vpop.f32.mrf.mxu0 }
 0x1fc   : > { %v422_v15 = vpop.f32.mrf.mxu0 }
 0x1fd   : > { %v427_v49 = vcombine.low %v420_v35, %v422_v15 }
 0x1ff   : > { %429 = vst [vmem:[%s263_s20] sm:$0xff] %v427_v49 }
 0x206   : > { %v1232_v17 = vpop.f32.mrf.mxu0 }
 0x208   : > { %v1234_v43 = vpop.f32.mrf.mxu0 }
 0x209   : > { %v1239_v10 = vcombine.low %v1232_v17, %v1234_v43 }
 0x20b   : > { %1410 = vst [vmem:[%s263_s20 + $0x10] sm:$0xff] %v1239_v10 }
 0x21a   : > { %v694_v39 = vpop.f32.mrf.mxu1 }
 0x21c   : > { %v696_v42 = vpop.f32.mrf.mxu1 }
 0x21d   : > { %v701_v26 = vcombine.low %v694_v39, %v696_v42 }
 0x21f   : > { %1406 = vst [vmem:[%s263_s20 + $0x8] sm:$0xff] %v701_v26 }
 0x220   : > { %1600 = shalt.err (!%p1597_p6)
}
 0x221   : > { %s1601_s5 = scalar_lea.hbm %s2303_s23, 512  ;;  %s1605_s2 = scalar_lea.hbm %s2354_s3, 1024 }
 0x222   : > { %p1602_p9 = scmp.ne.s32.totalorder %s2303_s23, %s1601_s5  ;;  %p1606_p11 = scmp.lt.s32.totalorder %s2303_s23, %s2354_s3 }
 0x223   : > { %p1607_p3 = scmp.lt.s32.totalorder %s1605_s2, %s1601_s5 }
 0x224   : > { %p1603_p12 = pnand %p1602_p9, %p1791_p0 }
 0x225   : > { %p1608_p1 = por %p1607_p3, %p1606_p11 }
 0x226   : > { %p1604_p13 = pneg %p1603_p12 }
 0x228   : > { %p1609_p4 = pnand %p1608_p1, %p1604_p13 }
 0x22a   : > { %1612 = shalt.err (!%p1609_p4)
}
 0x22b   : > { %s1686_s14 = smov 128   ;;  %s1687_s22 = smov 8  }
 0x22c   : > { %1428 = dma.vmem_to_hbm [thread:$0]  (%p1791_p0), %s2298_s29, 512, %s2303_s23, %s1247_s24, %s1686_s14, %s1686_s14, %s1687_s22  }
 0x22d PF: > { %s1277_s11 = sand.u32 1, %s1655_s12   ;;  %p2372_p8 = scmp.ne.s32.totalorder %s2361_s21, 0 }
 0x22e   : > { %s1278_s28 = scalar_lea.sflag [#allocation4], %s1277_s11 }
 0x22f   : > { %p1442_p5 = pnand %p1388_p10, %p2372_p8 }
 0x231   : > { %p1443_p7 = pneg %p1442_p5 }
 0x233   : > { %1650 = dma.done.wait (%p1443_p7), %s1278_s28, 512  }
 0x234   : > { %1652 = vsyncadd (%p1443_p7), %s1278_s28, 4294966784  ;;  %s22_s17 = sadd.s32 1, %s1675_s17   ;;  %s2373_s18 = sld [smem:[#allocation13_spill]] }
 0x235   : > { %p19_p2 = scmp.ge.s32.totalorder %s22_s17, 4   ;;  %s2374_s14 = sld [smem:[#allocation15_spill]] }
 0x236   : > { %s2375_s7 = sld [smem:[#allocation14_spill]]  ;;  %s2376_s12 = smov %s1659_s13 }
 0x237   : > { %s2378_s15 = smov %s1671_s16 }
 0x238   :  { %21 = sbr.rel (!%p19_p2) target bundleno = 11 (0xb), region = 97 }
 0x23a   : > { %s2377_s13 = smov %s2373_s18 }
 0x23c   : > { %s2379_s16 = smov %s2375_s7 }
 0x23d   :  { %1283 = vsyncpa [#allocation3], 1 }
 0x23e   :  { %1285 = vsyncpa [#allocation3 + $0x1], 1 }
 0x23f   :  { %1286 = vsyncpa [#allocation6], 1 }
 0x240   :  { %1288 = vsyncpa [#allocation6 + $0x1], 1 }
 0x241   :  { %1289 = vsyncpa [#allocation4], 1 }
 0x242   :  { %1291 = vsyncpa [#allocation4 + $0x1], 1 }

</bundles_post_ra>
